<compile_context>
chip_gen: v6e
topology: v6e:2x2x1
jax: 0.10.0
libtpu: 0.0.40
codegen_flags: <defaults>
</compile_context>

<pallas_src>
import functools

import jax
import jax.numpy as jnp
from jax.experimental import pallas as pl
from jax.experimental.pallas import tpu as pltpu


def _round_up(x, m):
    return (x + m - 1) // m * m


def _cdiv(a, b):
    return -(-a // b)


def _sublane_granule(*dtypes):
    g = 8
    for dt in dtypes:
        g = max(g, 8 * (4 // max(1, jnp.dtype(dt).itemsize)))
    return g


# -----------------------------------------------------------------------------
# Fused Pallas kernel: both Q heads in one MLP chain, elementwise max at the end
# -----------------------------------------------------------------------------
def fused_double_q_kernel(obs_ref, act_ref,
                          w1o_ref, w1a_ref, b1_ref,
                          w2_ref, b2_ref,
                          w3_ref, b3_ref,
                          out_ref, *, use_tanh: bool, scale: float,
                          split_heads: bool, hidden_dim: int, compute_dtype):
    f32 = jnp.float32
    cdt = compute_dtype
    H = hidden_dim

    # Layer 1: concat([obs, act], -1) @ W1 computed as two dots (no lane-axis
    # concat in the kernel); both heads share a single [bt, 2H] output.
    x_obs = obs_ref[...].astype(cdt)
    x_act = act_ref[...].astype(cdt)
    h = jnp.dot(x_obs, w1o_ref[...], preferred_element_type=f32)
    h = h + jnp.dot(x_act, w1a_ref[...], preferred_element_type=f32)
    h = jnp.maximum(h + b1_ref[...], 0.0)                        # [bt, 2H] f32

    b2 = b2_ref[...]
    if split_heads:
        # H multiple of 128: two independent [H, H] layer-2 dots (no
        # multiply-by-zero MACs, half the resident W2 VMEM of block-diag 2Hx2H).
        g1 = jnp.dot(h[:, :H].astype(cdt), w2_ref[0],
                     preferred_element_type=f32) + b2[:, :H]
        g2 = jnp.dot(h[:, H:].astype(cdt), w2_ref[1],
                     preferred_element_type=f32) + b2[:, H:]
        g1 = jnp.maximum(g1, 0.0)
        g2 = jnp.maximum(g2, 0.0)
        q1 = jnp.dot(g1.astype(cdt), w3_ref[:H, 0:1],
                     preferred_element_type=f32) + b3_ref[:, 0:1]   # [bt, 1]
        q2 = jnp.dot(g2.astype(cdt), w3_ref[H:, 1:2],
                     preferred_element_type=f32) + b3_ref[:, 1:2]   # [bt, 1]
    else:
        # Small H: single block-diagonal [2H, 2H] layer-2 dot.
        g = jnp.dot(h.astype(cdt), w2_ref[...],
                    preferred_element_type=f32) + b2
        g = jnp.maximum(g, 0.0)                                   # [bt, 2H]
        # Both 1-wide heads as columns of one [2H, 2] weight -> [bt, 2] on MXU.
        q12 = jnp.dot(g.astype(cdt), w3_ref[...],
                      preferred_element_type=f32) + b3_ref[...]   # [bt, 2]
        q1 = q12[:, 0:1]
        q2 = q12[:, 1:2]

    # max BEFORE tanh: exact (tanh monotone increasing, scale > 0); halves the
    # EUP transcendental work. Scale folded once after the max.
    q = jnp.maximum(q1, q2)                                       # [bt, 1]
    if use_tanh:
        q = jnp.tanh(q) * scale

    # Only the tiny [bt, 1] result goes through the XLU: lane-dense [1, bt] store.
    out_ref[...] = q.T[None].astype(out_ref.dtype)                # [1, 1, bt]


# -----------------------------------------------------------------------------
# Batch tile selection: large, VMEM-safe, sublane-aligned, even tile count
# -----------------------------------------------------------------------------
def _pick_batch_tile(B, batch_tile, granule, bytes_per_row):
    vmem_budget = 12 * 1024 * 1024        # stays under v5e's 16 MiB scoped default
    B_al = _round_up(max(B, 1), granule)
    cap = max(granule, (vmem_budget // max(1, bytes_per_row)) // granule * granule)
    bt = max(granule, min((int(batch_tile) // granule) * granule, cap, B_al))
    n = _cdiv(B_al, bt)
    if B_al >= 2 * granule:
        # Prefer >= 2 tiles and an even count so the "parallel" batch axis
        # splits evenly across both TensorCores on v7x.
        if n < 2:
            n = 2
        if n % 2:
            n += 1
        bt = max(granule, _round_up(_cdiv(B_al, n), granule))
    B_pad = _round_up(B, bt)
    return bt, B_pad


# -----------------------------------------------------------------------------
# Wrapper: parameter fusion + batch tiling + pallas_call
# -----------------------------------------------------------------------------
def double_q_critic_max(obs, action, q1_params, q2_params, *,
                        use_tanh=True, gamma=0.99,
                        compute_dtype=None, batch_tile=4096):
    """Forward pass of DoubleQCriticMax: max(Q1(s,a), Q2(s,a)).

    q*_params = (w1 [D,H], b1 [1,H], w2 [H,H], b2 [1,H], w3 [H,1], b3 [1,1]),
    weights stored as [in_features, out_features].
    """
    # TODO(synk): the module's both=True path returns (q1, q2); this kernel
    # implements the default both=False (elementwise max) path.
    assert obs.shape[0] == action.shape[0]
    assert 0.0 <= gamma < 1.0   # max-before-tanh + scale folding need scale > 0
    B, obs_dim = obs.shape
    act_dim = action.shape[1]
    H = q1_params[0].shape[1]
    H2 = 2 * H

    # MXU compute dtype. Default = input dtype (no standalone wrapper astype of
    # the HBM activations; pass bf16 obs/act to stream half the bytes and run
    # the MXU at bf16 rate). A different requested dtype is cast in-kernel.
    if compute_dtype is None:
        compute_dtype = obs.dtype
    compute_dtype = jnp.dtype(compute_dtype)

    # ---- fuse the two heads' parameters (tiny, one-time) --------------------
    w1_1, b1_1, w2_1, b2_1, w3_1, b3_1 = q1_params
    w1_2, b1_2, w2_2, b2_2, w3_2, b3_2 = q2_params

    w1 = jnp.concatenate([w1_1, w1_2], axis=1)                    # [D, 2H]
    w1o = w1[:obs_dim].astype(compute_dtype)                      # no kernel concat
    w1a = w1[obs_dim:].astype(compute_dtype)
    b1 = jnp.concatenate([b1_1, b1_2], axis=1).astype(jnp.float32)    # [1, 2H]

    split_heads = (H % 128 == 0)
    if split_heads:
        w2 = jnp.stack([w2_1, w2_2], axis=0).astype(compute_dtype)    # [2, H, H]
    else:
        z = jnp.zeros((H, H), w2_1.dtype)
        w2 = jnp.block([[w2_1, z], [z, w2_2]]).astype(compute_dtype)  # [2H, 2H]
    b2 = jnp.concatenate([b2_1, b2_2], axis=1).astype(jnp.float32)    # [1, 2H]

    w3 = jnp.zeros((H2, 2), jnp.float32)
    w3 = w3.at[:H, 0:1].set(w3_1).at[H:, 1:2].set(w3_2)
    w3 = w3.astype(compute_dtype)                                     # [2H, 2]
    b3 = jnp.concatenate([b3_1, b3_2], axis=1).astype(jnp.float32)    # [1, 2]

    # ---- batch tiling --------------------------------------------------------
    granule = _sublane_granule(obs.dtype, action.dtype, compute_dtype)
    in_itemsize = max(jnp.dtype(obs.dtype).itemsize,
                      jnp.dtype(action.dtype).itemsize)
    # Rough live bytes per batch row: double-buffered input tiles + the f32
    # hidden activations of both layers (with slack).
    bytes_per_row = 2 * (obs_dim + act_dim) * in_itemsize + 3 * H2 * 4
    bt, B_pad = _pick_batch_tile(B, batch_tile, granule, bytes_per_row)
    n_tiles = B_pad // bt

    obs_in, act_in = obs, action
    if B_pad != B:
        obs_in = jnp.pad(obs_in, ((0, B_pad - B), (0, 0)))
        act_in = jnp.pad(act_in, ((0, B_pad - B), (0, 0)))

    # TODO(synk): if the call site keeps a pre-concatenated [B, obs+act] buffer,
    # take it as a single operand (one contiguous-row DMA + one layer-1 dot).

    kernel = functools.partial(
        fused_double_q_kernel,
        use_tanh=bool(use_tanh),
        scale=float(1.0 / (1.0 - gamma)),
        split_heads=split_heads,
        hidden_dim=H,
        compute_dtype=compute_dtype,
    )

    def const_spec(shape):
        return pl.BlockSpec(shape, lambda i, n=len(shape): (0,) * n)

    out = pl.pallas_call(
        kernel,
        out_shape=jax.ShapeDtypeStruct((n_tiles, 1, bt), jnp.float32),
        grid_spec=pltpu.PrefetchScalarGridSpec(
            num_scalar_prefetch=0,
            grid=(n_tiles,),
            in_specs=[
                pl.BlockSpec((bt, obs_dim), lambda i: (i, 0)),
                pl.BlockSpec((bt, act_dim), lambda i: (i, 0)),
                const_spec(w1o.shape), const_spec(w1a.shape), const_spec(b1.shape),
                const_spec(w2.shape), const_spec(b2.shape),
                const_spec(w3.shape), const_spec(b3.shape),
            ],
            out_specs=pl.BlockSpec((1, 1, bt), lambda i: (i, 0, 0)),
        ),
        compiler_params=pltpu.CompilerParams(
            dimension_semantics=("parallel",)),   # v7x: shard batch over 2 TCs
    )(obs_in, act_in, w1o, w1a, b1, w2, b2, w3, b3)

    return out.reshape(B_pad, 1)[:B]


# -----------------------------------------------------------------------------
# Deterministic parameter init (orthogonal weights, zero biases)
# -----------------------------------------------------------------------------
def orthogonal(key, shape, dtype=jnp.float32):
    rows, cols = shape
    n = max(rows, cols)
    a = jax.random.normal(key, (n, n), dtype=jnp.float32)
    q, r = jnp.linalg.qr(a)
    d = jnp.diag(r)
    q = q * jnp.where(d == 0, 1.0, jnp.sign(d))
    return q[:rows, :cols].astype(dtype)


def init_mlp_params(key, in_dim, hidden_dim, out_dim):
    k1, k2, k3 = jax.random.split(key, 3)
    w1 = orthogonal(k1, (in_dim, hidden_dim))
    b1 = jnp.zeros((1, hidden_dim), jnp.float32)
    w2 = orthogonal(k2, (hidden_dim, hidden_dim))
    b2 = jnp.zeros((1, hidden_dim), jnp.float32)
    w3 = orthogonal(k3, (hidden_dim, out_dim))
    b3 = jnp.zeros((1, out_dim), jnp.float32)
    return (w1, b1, w2, b2, w3, b3)


# -----------------------------------------------------------------------------
# Reference (pure JAX) for sanity check
# -----------------------------------------------------------------------------
def reference_forward(obs, action, q1p, q2p, use_tanh, gamma):
    oa = jnp.concatenate([obs, action], axis=-1)

    def mlp(x, p):
        w1, b1, w2, b2, w3, b3 = p
        h = jnp.maximum(x @ w1 + b1, 0.0)
        h = jnp.maximum(h @ w2 + b2, 0.0)
        return h @ w3 + b3

    q1 = mlp(oa, q1p)
    q2 = mlp(oa, q2p)
    if use_tanh:
        q1 = jnp.tanh(q1) / (1.0 - gamma)
        q2 = jnp.tanh(q2) / (1.0 - gamma)
    return jnp.maximum(q1, q2)


if __name__ == "__main__":
    key = jax.random.PRNGKey(0)
    keys = jax.random.split(key, 10)
    gamma, use_tanh = 0.99, True

    # --- check 1: small batch, small H (fused block-diag W2 path, 1 tile) ----
    batch, obs_dim, action_dim, hidden_dim = 8, 24, 8, 32
    in_dim = obs_dim + action_dim
    obs = jax.random.normal(keys[0], (batch, obs_dim), jnp.float32)
    action = jax.random.normal(keys[1], (batch, action_dim), jnp.float32)
    q1p = init_mlp_params(keys[2], in_dim, hidden_dim, 1)
    q2p = init_mlp_params(keys[3], in_dim, hidden_dim, 1)

    out = double_q_critic_max(obs, action, q1p, q2p,
                              use_tanh=use_tanh, gamma=gamma)
    out = jax.block_until_ready(out)
    ref = reference_forward(obs, action, q1p, q2p, use_tanh, gamma)
    assert out.shape == (batch, 1)
    assert jnp.allclose(out, ref, atol=1e-3, rtol=1e-4)

    # --- check 2: unaligned batch, multiple tiles, explicit tiny tile --------
    b2n = 20
    obs2 = jax.random.normal(keys[4], (b2n, obs_dim), jnp.float32)
    act2 = jax.random.normal(keys[5], (b2n, action_dim), jnp.float32)
    out2 = double_q_critic_max(obs2, act2, q1p, q2p, use_tanh=use_tanh,
                               gamma=gamma, batch_tile=8)
    out2 = jax.block_until_ready(out2)
    ref2 = reference_forward(obs2, act2, q1p, q2p, use_tanh, gamma)
    assert out2.shape == (b2n, 1)
    assert jnp.allclose(out2, ref2, atol=1e-3, rtol=1e-4)

    # --- check 3: H multiple of 128 -> split-heads path (two [H,H] dots) -----
    hidden_big, b3n = 128, 16
    obs3 = jax.random.normal(keys[6], (b3n, obs_dim), jnp.float32)
    act3 = jax.random.normal(keys[7], (b3n, action_dim), jnp.float32)
    q1p_big = init_mlp_params(keys[8], in_dim, hidden_big, 1)
    q2p_big = init_mlp_params(keys[9], in_dim, hidden_big, 1)
    out3 = double_q_critic_max(obs3, act3, q1p_big, q2p_big,
                               use_tanh=use_tanh, gamma=gamma)
    out3 = jax.block_until_ready(out3)
    ref3 = reference_forward(obs3, act3, q1p_big, q2p_big, use_tanh, gamma)
    assert out3.shape == (b3n, 1)
    assert jnp.allclose(out3, ref3, atol=2e-3, rtol=1e-3)

    print("KERNEL_OK")
</pallas_src>

<mosaic_0001>
module attributes {stable_mosaic.version = 11 : i64} {
  func.func @fused_double_q_kernel(%arg0: i32, %arg1: memref<8x24xf32, #tpu.memory_space<vmem>>, %arg2: memref<8x8xf32, #tpu.memory_space<vmem>>, %arg3: memref<24x64xf32, #tpu.memory_space<vmem>>, %arg4: memref<8x64xf32, #tpu.memory_space<vmem>>, %arg5: memref<1x64xf32, #tpu.memory_space<vmem>>, %arg6: memref<64x64xf32, #tpu.memory_space<vmem>>, %arg7: memref<1x64xf32, #tpu.memory_space<vmem>>, %arg8: memref<64x2xf32, #tpu.memory_space<vmem>>, %arg9: memref<1x2xf32, #tpu.memory_space<vmem>>, %arg10: memref<1x1x8xf32, #tpu.memory_space<vmem>>) attributes {dimension_semantics = [#tpu.dimension_semantics<parallel>], iteration_bounds = array<i64: 1>, scalar_prefetch = 0 : i64, scratch_operands = 0 : i64, tpu.core_type = #tpu.core_type<tc>, window_params = [{transform_indices = @transform_0, window_bounds = array<i64: 8, 24>}, {transform_indices = @transform_1, window_bounds = array<i64: 8, 8>}, {pipeline_mode = #tpu.pipeline_mode<synchronous>, transform_indices = @transform_2, window_bounds = array<i64: 24, 64>}, {pipeline_mode = #tpu.pipeline_mode<synchronous>, transform_indices = @transform_3, window_bounds = array<i64: 8, 64>}, {pipeline_mode = #tpu.pipeline_mode<synchronous>, transform_indices = @transform_4, window_bounds = array<i64: 1, 64>}, {pipeline_mode = #tpu.pipeline_mode<synchronous>, transform_indices = @transform_5, window_bounds = array<i64: 64, 64>}, {pipeline_mode = #tpu.pipeline_mode<synchronous>, transform_indices = @transform_6, window_bounds = array<i64: 1, 64>}, {pipeline_mode = #tpu.pipeline_mode<synchronous>, transform_indices = @transform_7, window_bounds = array<i64: 64, 2>}, {pipeline_mode = #tpu.pipeline_mode<synchronous>, transform_indices = @transform_8, window_bounds = array<i64: 1, 2>}, {transform_indices = @transform_9, window_bounds = array<i64: 1, 1, 8>}]} {
    %c0 = arith.constant 0 : index
    %c0_0 = arith.constant 0 : index
    %0 = vector.load %arg1[%c0, %c0_0] : memref<8x24xf32, #tpu.memory_space<vmem>>, vector<8x24xf32>
    %c0_1 = arith.constant 0 : index
    %c0_2 = arith.constant 0 : index
    %1 = vector.load %arg2[%c0_1, %c0_2] : memref<8x8xf32, #tpu.memory_space<vmem>>, vector<8x8xf32>
    %c0_3 = arith.constant 0 : index
    %c0_4 = arith.constant 0 : index
    %2 = vector.load %arg3[%c0_3, %c0_4] : memref<24x64xf32, #tpu.memory_space<vmem>>, vector<24x64xf32>
    %cst = arith.constant dense<0.000000e+00> : vector<8x64xf32>
    %3 = tpu.matmul %0, %2, %cst {dimension_numbers = #tpu.dot_dimension_numbers<[1], [0], [0], [1], [0, 0, 1, 1], [], []>} : vector<8x24xf32>, vector<24x64xf32>, vector<8x64xf32> -> vector<8x64xf32>
    %c0_5 = arith.constant 0 : index
    %c0_6 = arith.constant 0 : index
    %4 = vector.load %arg4[%c0_5, %c0_6] : memref<8x64xf32, #tpu.memory_space<vmem>>, vector<8x64xf32>
    %cst_7 = arith.constant dense<0.000000e+00> : vector<8x64xf32>
    %5 = tpu.matmul %1, %4, %cst_7 {dimension_numbers = #tpu.dot_dimension_numbers<[1], [0], [0], [1], [0, 0, 1, 1], [], []>} : vector<8x8xf32>, vector<8x64xf32>, vector<8x64xf32> -> vector<8x64xf32>
    %6 = arith.addf %3, %5 : vector<8x64xf32>
    %c0_8 = arith.constant 0 : index
    %c0_9 = arith.constant 0 : index
    %7 = vector.load %arg5[%c0_8, %c0_9] : memref<1x64xf32, #tpu.memory_space<vmem>>, vector<1x64xf32>
    %8 = vector.broadcast %7 : vector<1x64xf32> to vector<8x64xf32>
    %9 = arith.addf %6, %8 : vector<8x64xf32>
    %cst_10 = arith.constant 0.000000e+00 : f32
    %10 = vector.broadcast %cst_10 : f32 to vector<8x64xf32>
    %11 = arith.maximumf %9, %10 : vector<8x64xf32>
    %c0_11 = arith.constant 0 : index
    %c0_12 = arith.constant 0 : index
    %12 = vector.load %arg7[%c0_11, %c0_12] : memref<1x64xf32, #tpu.memory_space<vmem>>, vector<1x64xf32>
    %c0_13 = arith.constant 0 : index
    %c0_14 = arith.constant 0 : index
    %13 = vector.load %arg6[%c0_13, %c0_14] : memref<64x64xf32, #tpu.memory_space<vmem>>, vector<64x64xf32>
    %cst_15 = arith.constant dense<0.000000e+00> : vector<8x64xf32>
    %14 = tpu.matmul %11, %13, %cst_15 {dimension_numbers = #tpu.dot_dimension_numbers<[1], [0], [0], [1], [0, 0, 1, 1], [], []>} : vector<8x64xf32>, vector<64x64xf32>, vector<8x64xf32> -> vector<8x64xf32>
    %15 = vector.broadcast %12 : vector<1x64xf32> to vector<8x64xf32>
    %16 = arith.addf %14, %15 : vector<8x64xf32>
    %cst_16 = arith.constant 0.000000e+00 : f32
    %17 = vector.broadcast %cst_16 : f32 to vector<8x64xf32>
    %18 = arith.maximumf %16, %17 : vector<8x64xf32>
    %c0_17 = arith.constant 0 : index
    %c0_18 = arith.constant 0 : index
    %19 = vector.load %arg8[%c0_17, %c0_18] : memref<64x2xf32, #tpu.memory_space<vmem>>, vector<64x2xf32>
    %cst_19 = arith.constant dense<0.000000e+00> : vector<8x2xf32>
    %20 = tpu.matmul %18, %19, %cst_19 {dimension_numbers = #tpu.dot_dimension_numbers<[1], [0], [0], [1], [0, 0, 1, 1], [], []>} : vector<8x64xf32>, vector<64x2xf32>, vector<8x2xf32> -> vector<8x2xf32>
    %c0_20 = arith.constant 0 : index
    %c0_21 = arith.constant 0 : index
    %21 = vector.load %arg9[%c0_20, %c0_21] : memref<1x2xf32, #tpu.memory_space<vmem>>, vector<1x2xf32>
    %22 = vector.broadcast %21 : vector<1x2xf32> to vector<8x2xf32>
    %23 = arith.addf %20, %22 : vector<8x2xf32>
    %24 = vector.extract_strided_slice %23 {offsets = [0, 0], sizes = [8, 1], strides = [1, 1]} : vector<8x2xf32> to vector<8x1xf32>
    %25 = vector.extract_strided_slice %23 {offsets = [0, 1], sizes = [8, 1], strides = [1, 1]} : vector<8x2xf32> to vector<8x1xf32>
    %26 = arith.maximumf %24, %25 : vector<8x1xf32>
    %27 = math.tanh %26 : vector<8x1xf32>
    %cst_22 = arith.constant 1.000000e+02 : f32
    %28 = vector.broadcast %cst_22 : f32 to vector<8x1xf32>
    %29 = arith.mulf %27, %28 : vector<8x1xf32>
    %30 = tpu.transpose %29, [1, 0] : vector<8x1xf32> -> vector<1x8xf32>
    %31 = vector.shape_cast %30 : vector<1x8xf32> to vector<1x1x8xf32>
    %c0_23 = arith.constant 0 : index
    %c0_24 = arith.constant 0 : index
    %c0_25 = arith.constant 0 : index
    %32 = vector.load %arg10[%c0_23, %c0_24, %c0_25] : memref<1x1x8xf32, #tpu.memory_space<vmem>>, vector<1x1x8xf32>
    tpu.vector_store %arg10[%c0_23, %c0_24, %c0_25], %31 {strides = array<i32>} : memref<1x1x8xf32, #tpu.memory_space<vmem>>, vector<1x1x8xf32>,
    return
  }
  func.func @transform_0(%arg0: i32) -> (i32, i32) {
    %c0_i32 = arith.constant 0 : i32
    %c0_i32_0 = arith.constant 0 : i32
    return %arg0, %c0_i32 : i32, i32
  }
  func.func @transform_1(%arg0: i32) -> (i32, i32) {
    %c0_i32 = arith.constant 0 : i32
    %c0_i32_0 = arith.constant 0 : i32
    return %arg0, %c0_i32 : i32, i32
  }
  func.func @transform_2(%arg0: i32) -> (i32, i32) {
    %c0_i32 = arith.constant 0 : i32
    %c0_i32_0 = arith.constant 0 : i32
    %c0_i32_1 = arith.constant 0 : i32
    return %c0_i32, %c0_i32_0 : i32, i32
  }
  func.func @transform_3(%arg0: i32) -> (i32, i32) {
    %c0_i32 = arith.constant 0 : i32
    %c0_i32_0 = arith.constant 0 : i32
    %c0_i32_1 = arith.constant 0 : i32
    return %c0_i32, %c0_i32_0 : i32, i32
  }
  func.func @transform_4(%arg0: i32) -> (i32, i32) {
    %c0_i32 = arith.constant 0 : i32
    %c0_i32_0 = arith.constant 0 : i32
    %c0_i32_1 = arith.constant 0 : i32
    return %c0_i32, %c0_i32_0 : i32, i32
  }
  func.func @transform_5(%arg0: i32) -> (i32, i32) {
    %c0_i32 = arith.constant 0 : i32
    %c0_i32_0 = arith.constant 0 : i32
    %c0_i32_1 = arith.constant 0 : i32
    return %c0_i32, %c0_i32_0 : i32, i32
  }
  func.func @transform_6(%arg0: i32) -> (i32, i32) {
    %c0_i32 = arith.constant 0 : i32
    %c0_i32_0 = arith.constant 0 : i32
    %c0_i32_1 = arith.constant 0 : i32
    return %c0_i32, %c0_i32_0 : i32, i32
  }
  func.func @transform_7(%arg0: i32) -> (i32, i32) {
    %c0_i32 = arith.constant 0 : i32
    %c0_i32_0 = arith.constant 0 : i32
    %c0_i32_1 = arith.constant 0 : i32
    return %c0_i32, %c0_i32_0 : i32, i32
  }
  func.func @transform_8(%arg0: i32) -> (i32, i32) {
    %c0_i32 = arith.constant 0 : i32
    %c0_i32_0 = arith.constant 0 : i32
    %c0_i32_1 = arith.constant 0 : i32
    return %c0_i32, %c0_i32_0 : i32, i32
  }
  func.func @transform_9(%arg0: i32) -> (i32, i32, i32) {
    %c0_i32 = arith.constant 0 : i32
    %c0_i32_0 = arith.constant 0 : i32
    %c0_i32_1 = arith.constant 0 : i32
    return %arg0, %c0_i32, %c0_i32_0 : i32, i32, i32
  }
}

</mosaic_0001>

<bundles_post_ra>
// kernel: tpu_custom_call.1
= control target key start
LH: loop header
LB: loop body
LE: loop exit
PB: predicated region body
PF: predicated region fallthrough
CT: control target
= control target key end

     0   :  { %14 = vsyncpa [#allocation3], 0  ;;  %s809_s0 = inlined_call_operand.vmem [shape: f32[8,24], index: 0, kind: input, shape index: {}]   ;;  %s810_s1 = inlined_call_operand.hbm [shape: f32[8,8], index: 1, kind: input, shape index: {}]   ;;  %s811_s2 = inlined_call_operand.hbm [shape: f32[24,64], index: 2, kind: input, shape index: {}]   ;;  %s812_s3 = inlined_call_operand.hbm [shape: f32[8,64], index: 3, kind: input, shape index: {}]   ;;  %s813_s4 = inlined_call_operand.vmem [shape: f32[1,64], index: 4, kind: input, shape index: {}]   ;;  %s814_s5 = inlined_call_operand.vmem [shape: f32[64,64], index: 5, kind: input, shape index: {}]   ;;  %s815_s6 = inlined_call_operand.vmem [shape: f32[1,64], index: 6, kind: input, shape index: {}]   ;;  %s816_s7 = inlined_call_operand.vmem [shape: f32[64,2], index: 7, kind: input, shape index: {}]   ;;  %s817_s8 = inlined_call_operand.vmem [shape: f32[1,2], index: 8, kind: input, shape index: {}]   ;;  %s818_s9 = inlined_call_operand.hbm [shape: f32[1,1,8], index: 9, kind: output, shape index: {}]  }
   0x1   :  { %15 = vsyncpa [#allocation6], 0 }
   0x2   :  { %16 = vsyncpa [#allocation4], 0  ;;  %s648_s30 = smov [#allocation5]  }
   0x3   :  { %s34_s10 = sshll.u32 %s648_s30, 4  ;;  %s35_s10 = int_to_ptr.vmem [resolvable:$true] %s34_s10 }
   0x4   :  { %s570_s11 = scalar_lea.vmem %s35_s10, 384  ;;  %p575_p1 = scmp.lt.s32.totalorder %s35_s10, %s35_s10 }
   0x5   :  { %p571_p0 = scmp.ne.s32.totalorder %s35_s10, %s570_s11  ;;  %p576_p2 = scmp.lt.s32.totalorder %s570_s11, %s570_s11 }
   0x7   :  { %p577_p3 = por %p576_p2, %p575_p1 }
   0x9   :  { %p578_p4 = pnand %p577_p3, %p571_p0 }
   0xb   :  { %581 = shalt.err (!%p578_p4)
}
   0xc   :  { %s649_s12 = smov 128   ;;  %s650_s13 = smov 8  }
   0xd   :  { %40 = dma.hbm_to_vmem [thread:$0]  %s811_s2, 384, %s35_s10, [#allocation6], %s649_s12, %s649_s12, %s650_s13  }
   0xe   :  { %s651_s16 = smov [#allocation2]   ;;  %s652_s18 = smov [#allocation7]  }
   0xf   :  { %s25_s17 = sshll.u32 %s651_s16, 4  ;;  %s47_s19 = sshll.u32 %s652_s18, 4  ;;  %s26_s17 = int_to_ptr.vmem [resolvable:$true] %s25_s17  ;;  %s48_s19 = int_to_ptr.vmem [resolvable:$true] %s47_s19 }
  0x10   :  { %s590_s20 = scalar_lea.vmem %s26_s17, 128  ;;  %p595_p6 = scmp.lt.s32.totalorder %s26_s17, %s26_s17 }
  0x11   :  { %p591_p5 = scmp.ne.s32.totalorder %s26_s17, %s590_s20  ;;  %p596_p7 = scmp.lt.s32.totalorder %s590_s20, %s590_s20 }
  0x13   :  { %p597_p8 = por %p596_p7, %p595_p6 }
  0x15   :  { %p598_p9 = pnand %p597_p8, %p591_p5 }
  0x17   :  { %601 = shalt.err (!%p598_p9)
}
  0x18   :  { %28 = dma.hbm_to_vmem [thread:$0]  %s810_s1, 128, %s26_s17, [#allocation3]  }
  0x19   :  { %s610_s23 = scalar_lea.vmem %s48_s19, 128  ;;  %p615_p11 = scmp.lt.s32.totalorder %s48_s19, %s48_s19 }
  0x1a   :  { %p611_p10 = scmp.ne.s32.totalorder %s48_s19, %s610_s23  ;;  %p616_p12 = scmp.lt.s32.totalorder %s610_s23, %s610_s23 }
  0x1c   :  { %p617_p13 = por %p616_p12, %p615_p11 }
  0x1e   :  { %p618_p0 = pnand %p617_p13, %p611_p10 }
  0x20   :  { %621 = shalt.err (!%p618_p0)
}
  0x21   :  { %50 = dma.hbm_to_vmem [thread:$0]  %s812_s3, 128, %s48_s19, [#allocation6]  }
  0x22   :  { %642 = dma.done.wait [#allocation3], 128  }
  0x23   :  { %643 = vsyncadd [#allocation3], 4294967168 }
  0x24   :  { %644 = dma.done.wait [#allocation6], 512  }
  0x25   :  { %645 = vsyncadd [#allocation6], 4294966784  ;;  %v653_v0 = vmov 0.0   ;;  %vm654_vm0 = vmmov 0   ;;  %vm76_vm1 = vcmask 64512   ;;  %v74_v1 = vld [vmem:[#allocation5 + $0x10] sm:$0xff] }
  0x26   :  { %504 = vmatprep.subr.mxu1 %v653_v0  ;;  %499 = vmatprep.subr.mxu0 %v653_v0  ;;  %v75_v2 = vld [vmem:[#allocation7] sm:$0xff]  ;;  %v73_v3 = vld [vmem:[#allocation5 + $0x8] sm:$0xff]  ;;  %v72_v5 = vld [vmem:[#allocation5] sm:$0xff]  ;;  %vm150_vm2 = vcmask 195584   ;;  %vm248_vm3 = vcmask 523264   ;;  %s655_s14 = smov 127  }
  0x27   :  { %501 = vmatprep.mubr.msk.f32.mxu0 %vm654_vm0, %v653_v0  ;;  %510 = vmatprep.mubr.msk.f32.mxu1 %vm654_vm0, %v653_v0  ;;  %v71_v4 = vld [vmem:[#allocation2] sm:$0xff]  ;;  %v241_v6 = vld [vmem:[%s814_s5 + $0x38] sm:$0xff]  ;;  %v240_v8 = vld [vmem:[%s814_s5 + $0x30] sm:$0xff]  ;;  %vm450_vm4 = vcmask 57344  }
  0x28   :  { %505 = vmatpush3.msra.mxu1 %v74_v1  ;;  %500 = vmatpush3.msra.mxu0 %v75_v2  ;;  %v70_v7 = vld [vmem:[%s809_s0] sm:$0xff]  ;;  %v239_v9 = vld [vmem:[%s814_s5 + $0x28] sm:$0xff]  ;;  %v237_v11 = vld [vmem:[%s814_s5 + $0x18] sm:$0xff] }
  0x29   :  { %506 = vmatprep.subr.mxu1 %v653_v0  ;;  %502 = vmatmul.mubr.msk.f32.vlgmr.msra.gmra.mxu0 %vm76_vm1, %v71_v4  ;;  %v238_v10 = vld [vmem:[%s814_s5 + $0x20] sm:$0xff]  ;;  %v236_v12 = vld [vmem:[%s814_s5 + $0x10] sm:$0xff]  ;;  %v235_v13 = vld [vmem:[%s814_s5 + $0x8] sm:$0xff] }
  0x2a   :  { %507 = vmatpush3.msra.mxu1 %v73_v3  ;;  %513 = vmatprep.subr.mxu0 %v653_v0  ;;  %v234_v14 = vld [vmem:[%s814_s5] sm:$0xff]  ;;  %v330_v15 = vld [vmem:[%s816_s7 + $0x38] sm:$0xff]  ;;  %v329_v16 = vld [vmem:[%s816_s7 + $0x30] sm:$0xff] }
  0x2b   :  { %508 = vmatprep.subr.mxu1 %v653_v0  ;;  %514 = vmatpush3.msra.mxu0 %v241_v6  ;;  %v328_v17 = vld [vmem:[%s816_s7 + $0x28] sm:$0xff]  ;;  %v327_v18 = vld [vmem:[%s816_s7 + $0x20] sm:$0xff]  ;;  %v326_v19 = vld [vmem:[%s816_s7 + $0x18] sm:$0xff] }
  0x2c   :  { %509 = vmatpush3.msra.mxu1 %v72_v5  ;;  %515 = vmatprep.subr.mxu0 %v653_v0  ;;  %v470_v23 = vld [vmem:[%s813_s4] ss:$0 sm:$0xff]  ;;  %v325_v28 = vld [vmem:[%s816_s7 + $0x10] sm:$0xff]  ;;  %v324_v29 = vld [vmem:[%s816_s7 + $0x8] sm:$0xff] }
  0x2d   :  { %511 = vmatmul.mubr.msk.f32.vlgmr.msra.gmra.mxu1 %vm150_vm2, %v70_v7  ;;  %516 = vmatpush3.msra.mxu0 %v240_v8  ;;  %v323_v30 = vld [vmem:[%s816_s7] sm:$0xff] }
  0x2e   :  { %517 = vmatprep.subr.mxu0 %v653_v0  ;;  %529 = vmatprep.mubr.msk.f32.mxu0 %vm654_vm0, %v653_v0  ;;  %v471_v31 = vld [vmem:[%s815_s6] ss:$0 sm:$0xff]  ;;  %s656_s6 = smov [#allocation8]  }
  0x2f   :  { %518 = vmatpush3.msra.mxu0 %v239_v9  ;;  %532 = vmatprep.subr.mxu1 %v653_v0  ;;  %v473_v36 = vld [vmem:[%s817_s8] ss:$0 sm:$0xff]  ;;  %s458_s7 = sshll.u32 %s656_s6, 4  ;;  %s459_s7 = int_to_ptr.vmem [resolvable:$true] %s458_s7 }
  0x30   :  { %519 = vmatprep.subr.mxu0 %v653_v0  ;;  %548 = vmatprep.mubr.msk.f32.mxu1 %vm654_vm0, %v653_v0  ;;  %s622_s15 = scalar_lea.vmem %s459_s7, 16  ;;  %s626_s8 = scalar_lea.vmem %s459_s7, 32 }
  0x31   :  { %520 = vmatpush3.msra.mxu0 %v238_v10  ;;  %533 = vmatpush3.msra.mxu1 %v330_v15  ;;  %p623_p1 = scmp.ne.s32.totalorder %s459_s7, %s622_s15  ;;  %p627_p2 = scmp.lt.s32.totalorder %s459_s7, %s459_s7 }
  0x32   :  { %521 = vmatprep.subr.mxu0 %v653_v0  ;;  %534 = vmatprep.subr.mxu1 %v653_v0  ;;  %p628_p3 = scmp.lt.s32.totalorder %s626_s8, %s622_s15 }
  0x33   :  { %522 = vmatpush3.msra.mxu0 %v237_v11  ;;  %535 = vmatpush3.msra.mxu1 %v329_v16 }
  0x34   :  { %523 = vmatprep.subr.mxu0 %v653_v0  ;;  %536 = vmatprep.subr.mxu1 %v653_v0  ;;  %p629_p4 = por %p628_p3, %p627_p2 }
  0x35   :  { %524 = vmatpush3.msra.mxu0 %v236_v12  ;;  %537 = vmatpush3.msra.mxu1 %v328_v17 }
  0x36   :  { %525 = vmatprep.subr.mxu0 %v653_v0  ;;  %538 = vmatprep.subr.mxu1 %v653_v0  ;;  %p630_p5 = pnand %p629_p4, %p623_p1 }
  0x37   :  { %526 = vmatpush3.msra.mxu0 %v235_v13  ;;  %539 = vmatpush3.msra.mxu1 %v327_v18 }
  0x38   :  { %527 = vmatprep.subr.mxu0 %v653_v0  ;;  %540 = vmatprep.subr.mxu1 %v653_v0 }
  0x39   :  { %528 = vmatpush3.msra.mxu0 %v234_v14  ;;  %541 = vmatpush3.msra.mxu1 %v326_v19 }
  0x3a   :  { %542 = vmatprep.subr.mxu1 %v653_v0 }
  0x3b   :  { %543 = vmatpush3.msra.mxu1 %v325_v28 }
  0x3c   :  { %544 = vmatprep.subr.mxu1 %v653_v0 }
  0x3d   :  { %545 = vmatpush3.msra.mxu1 %v324_v29 }
  0x3e   :  { %546 = vmatprep.subr.mxu1 %v653_v0 }
  0x3f   :  { %547 = vmatpush3.msra.mxu1 %v323_v30 }
  0xe9   :  { %v146_v20 = vpop.f32.mrf.mxu0 }
  0xeb   :  { %v503_v21 = vpop.f32.mrf.mxu0 }
  0xed   :  { %v220_v22 = vpop.f32.mrf.mxu1 }
  0xee   :  { %v221_v24 = vadd.f32 %v220_v22, %v146_v20 }
  0xef   :  { %v512_v25 = vpop.f32.mrf.mxu1 }
  0xf0   :  { %v231_v26 = vadd.f32 %v470_v23, %v221_v24 }
  0xf2   :  { %v232_v27 = vmax.f32 %v231_v26, 0.0 }
  0xf4   :  { %530 = vmatmul.mubr.msk.f32.vlgmr.msra.gmra.mxu0 %vm248_vm3, %v232_v27 }
 0x1b4   :  { %v318_v32 = vpop.f32.mrf.mxu0 }
 0x1b5   :  { %v319_v33 = vadd.f32 %v471_v31, %v318_v32 }
 0x1b6   :  { %v531_v34 = vpop.f32.mrf.mxu0 }
 0x1b7   :  { %v322_v35 = vmax.f32 %v319_v33, 0.0 }
 0x1b9   :  { %549 = vmatmul.mubr.msk.f32.vlgmr.msra.gmra.mxu1 %vm248_vm3, %v322_v35 }
 0x279   :  { %v407_v37 = vpop.f32.mrf.mxu1 }
 0x27a   :  { %v408_v38 = vadd.f32 %v473_v36, %v407_v37 }
 0x27b   :  { %v550_v39 = vpop.f32.mrf.mxu1 }
 0x27c   :  { %412 = vrot.lane.b32.xlu0 %v408_v38, %s655_s14 }
 0x2ee   :  { %v413_v40 = vpop.permute.xlu0 %412 }
 0x2ef   :  { %v415_v41 = vmax.f32 %v408_v38, %v413_v40 }
 0x2f1   :  { %560 = vtanh.f32 %v415_v41 }
 0x2fe   :  { %v561_v42 = vpop.eup %560 }
 0x2ff   :  { %v417_v43 = vmul.f32 100.0, %v561_v42 }
 0x301   :  { %418 = vxpose.xlu0.b32.start.end [1/1] (short) (narrow) %v417_v43, 8 }
 0x37d   :  { %v434_v44 = vpop.trf.xlu0 }
 0x37e   :  { %451 = vst.msk [vmem:[#allocation8] sm:$0x1] %vm450_vm4, %v434_v44 }
 0x37f   :  { %633 = shalt.err (!%p630_p5)
}
 0x380   :  { %461 = dma.vmem_to_hbm [thread:$0]  %s459_s7, 16, %s818_s9, [#allocation4]  }
 0x381   :  { %646 = dma.done.wait [#allocation4], 16  }
 0x382   :  { %647 = vsyncadd [#allocation4], 4294967280 }
 0x383   :  { %465 = vsyncpa [#allocation3], 1 }
 0x384   :  { %466 = vsyncpa [#allocation6], 1 }
 0x385   :  { %467 = vsyncpa [#allocation4], 1 }

</bundles_post_ra>
